<compile_context>
chip_gen: v6e
topology: v6e:2x2x1
jax: 0.10.0
libtpu: 0.0.40
codegen_flags: <defaults>
</compile_context>

<pallas_src>
import jax
import jax.numpy as jnp
from jax.experimental import pallas as pl
from jax.experimental.pallas import tpu as pltpu

LANES = 128


# ----------------------------------------------------------------------------
# Pure-JAX reference (also used as the small-batch fast path).
# ----------------------------------------------------------------------------
def euler_cell_buck_ref(inputs, states, dt, L, Co, Ro):
    """Pure-JAX forward mirroring the PyTorch module."""
    iL = states[:, 0]
    vo = states[:, 1]
    va = inputs[:, 0]
    idx = (va == 0.0) & (iL <= 0.0)
    va = jnp.where(idx, vo, va)
    iL_next = jnp.maximum(iL + dt / L * (va - vo), 0.0)
    vC_next = vo + dt / Co * (iL - vo / Ro)
    return jnp.stack((iL_next, vC_next), axis=1)


# ----------------------------------------------------------------------------
# Helpers.
# ----------------------------------------------------------------------------
def _scalar_f32(x):
    return jnp.asarray(x, jnp.float32).reshape(())


def _coefs(dt, L, Co, Ro):
    """(dt/L, dt/Co, 1 - dt/(Co*Ro)) as a (3,) f32 array (jit/trace friendly)."""
    dt = _scalar_f32(dt)
    L = _scalar_f32(L)
    Co = _scalar_f32(Co)
    Ro = _scalar_f32(Ro)
    return jnp.stack([dt / L, dt / Co, 1.0 - dt / (Co * Ro)])


def _pick_tile(rows, tile_rows):
    """Pick block rows `tr` (multiple of 8, or == rows) and padded row count."""
    if rows <= 8:
        return rows, rows                      # single full-array block (legal)
    # At least 2 blocks so the 'parallel' grid axis can split across TensorCores.
    half = (((rows + 1) // 2) + 7) // 8 * 8
    tr = max(8, min(tile_rows, half))
    rows_p = -(-rows // tr) * tr
    return tr, rows_p


def _vmem_limit(tr):
    # ~5 tiled operands x 2 buffers (+ scratch) with headroom; clamp sensibly.
    return int(min(96 << 20, max(32 << 20, 16 * tr * LANES * 4)))


# ----------------------------------------------------------------------------
# Single-step kernel (module forward).
# ----------------------------------------------------------------------------
def _euler_step_kernel(coef_ref, va_ref, iL_ref, vC_ref, iL_out_ref, vC_out_ref):
    dt_L = coef_ref[0]
    dt_Co = coef_ref[1]
    c_vC = coef_ref[2]          # 1 - dt/(Co*Ro)

    iL = iL_ref[...]
    vC = vC_ref[...]
    va = va_ref[...]
    # Diode / discontinuous-conduction branch: where va==0 and iL<=0, va := vC.
    va = jnp.where((va == 0.0) & (iL <= 0.0), vC, va)

    iL_out_ref[...] = jnp.maximum(iL + dt_L * (va - vC), 0.0)
    # vC + dt/Co*(iL - vC/Ro) reassociated into FMA-friendly c*vC + (dt/Co)*iL.
    vC_out_ref[...] = c_vC * vC + dt_Co * iL


def euler_cell_buck_planar(va, iL, vC, dt, L, Co, Ro, *, tile_rows=2048):
    """Lane-dense entry point: va/iL/vC are (R, 128) f32; returns (iL_n, vC_n)
    in the same layout.  No slicing/stacking plumbing at all."""
    R = va.shape[0]
    coefs = _coefs(dt, L, Co, Ro)
    tr, rows_p = _pick_tile(R, tile_rows)
    if rows_p != R:                            # cheap row-granularity pad
        padr = rows_p - R
        va = jnp.pad(va, ((0, padr), (0, 0)))
        iL = jnp.pad(iL, ((0, padr), (0, 0)))
        vC = jnp.pad(vC, ((0, padr), (0, 0)))

    spec = pl.BlockSpec((tr, LANES), lambda i: (i, 0))
    smem_spec = pl.BlockSpec(memory_space=pltpu.MemorySpace.SMEM)

    iL_n, vC_n = pl.pallas_call(
        _euler_step_kernel,
        out_shape=(jax.ShapeDtypeStruct((rows_p, LANES), jnp.float32),
                   jax.ShapeDtypeStruct((rows_p, LANES), jnp.float32)),
        grid=(rows_p // tr,),
        in_specs=[smem_spec, spec, spec, spec],
        out_specs=(spec, spec),
        compiler_params=pltpu.CompilerParams(
            dimension_semantics=("parallel",),
            vmem_limit_bytes=_vmem_limit(tr)),
    )(coefs,
      va.astype(jnp.float32),
      iL.astype(jnp.float32),
      vC.astype(jnp.float32))

    if rows_p != R:
        iL_n, vC_n = iL_n[:R], vC_n[:R]
    return iL_n, vC_n


def euler_cell_buck(inputs, states, dt, L, Co, Ro, *,
                    tile_rows=2048, min_pallas_batch=1 << 16):
    """Module-interface forward.

    inputs: (B, 1) f32 (va), states: (B, 2) f32 (iL, vC) -> (B, 2) [iL_n, vC_n].
    """
    B = inputs.shape[0]
    if B < min_pallas_batch:
        # Small-batch fast path: XLA fuses the elementwise math into one kernel
        # with no layout plumbing; the Pallas path only earns its keep at large B.
        return euler_cell_buck_ref(inputs, states, dt, L, Co, Ro)

    va = inputs[:, 0].astype(jnp.float32)
    iL = states[:, 0].astype(jnp.float32)
    vC = states[:, 1].astype(jnp.float32)

    rows = -(-B // LANES)
    _, rows_p = _pick_tile(rows, tile_rows)
    pad = rows_p * LANES - B

    def planar(x):
        # Zero padding is benign for this cell (padded lanes stay exactly zero).
        return jnp.pad(x, (0, pad)).reshape(rows_p, LANES)

    iL_n, vC_n = euler_cell_buck_planar(planar(va), planar(iL), planar(vC),
                                        dt, L, Co, Ro, tile_rows=tile_rows)
    return jnp.stack((iL_n.reshape(-1)[:B], vC_n.reshape(-1)[:B]), axis=1)


# ----------------------------------------------------------------------------
# Fused T-step rollout (the real recurrent PANN use-case): state resident in
# VMEM scratch across the trailing "arbitrary" time axis; only va(t) streams.
# ----------------------------------------------------------------------------
def _euler_rollout_kernel(coef_ref, va_ref, iL0_ref, vC0_ref,
                          iL_out_ref, vC_out_ref, iL_sc, vC_sc):
    t = pl.program_id(1)

    @pl.when(t == 0)
    def _():
        iL_sc[...] = iL0_ref[...]
        vC_sc[...] = vC0_ref[...]

    dt_L = coef_ref[0]
    dt_Co = coef_ref[1]
    c_vC = coef_ref[2]

    iL = iL_sc[...]
    vC = vC_sc[...]
    va = va_ref[0]                              # block (1, tr, 128) -> (tr, 128)
    va = jnp.where((va == 0.0) & (iL <= 0.0), vC, va)
    iL_sc[...] = jnp.maximum(iL + dt_L * (va - vC), 0.0)
    vC_sc[...] = c_vC * vC + dt_Co * iL         # uses OLD iL, matching the module

    @pl.when(t == pl.num_programs(1) - 1)
    def _():
        iL_out_ref[...] = iL_sc[...]
        vC_out_ref[...] = vC_sc[...]


def euler_buck_rollout(va_seq, states, dt, L, Co, Ro, *, tile_rows=2048):
    """Run T explicit-Euler steps fused in one kernel.

    va_seq: (T, B) f32, states: (B, 2) f32 -> final state (B, 2).
    """
    T, B = va_seq.shape
    coefs = _coefs(dt, L, Co, Ro)
    rows = -(-B // LANES)
    tr, rows_p = _pick_tile(rows, tile_rows)
    pad = rows_p * LANES - B

    def planar(x):
        return jnp.pad(x.astype(jnp.float32), (0, pad)).reshape(rows_p, LANES)

    va_t = jnp.pad(va_seq.astype(jnp.float32),
                   ((0, 0), (0, pad))).reshape(T, rows_p, LANES)
    iL0 = planar(states[:, 0])
    vC0 = planar(states[:, 1])

    state_spec = pl.BlockSpec((tr, LANES), lambda i, t: (i, 0))

    iL_n, vC_n = pl.pallas_call(
        _euler_rollout_kernel,
        out_shape=(jax.ShapeDtypeStruct((rows_p, LANES), jnp.float32),
                   jax.ShapeDtypeStruct((rows_p, LANES), jnp.float32)),
        grid=(rows_p // tr, T),
        in_specs=[pl.BlockSpec(memory_space=pltpu.MemorySpace.SMEM),
                  pl.BlockSpec((1, tr, LANES), lambda i, t: (t, i, 0)),
                  state_spec,
                  state_spec],
        out_specs=(state_spec, state_spec),
        scratch_shapes=[pltpu.VMEM((tr, LANES), jnp.float32),
                        pltpu.VMEM((tr, LANES), jnp.float32)],
        compiler_params=pltpu.CompilerParams(
            dimension_semantics=("parallel", "arbitrary"),
            vmem_limit_bytes=_vmem_limit(tr)),
    )(coefs, va_t, iL0, vC0)

    return jnp.stack((iL_n.reshape(-1)[:B], vC_n.reshape(-1)[:B]), axis=1)


# ----------------------------------------------------------------------------
# Self-test.
# ----------------------------------------------------------------------------
if __name__ == "__main__":
    key = jax.random.PRNGKey(0)
    k1, k2, k3, k4, k5 = jax.random.split(key, 5)

    # Module "parameters" (__init__ args / nn.Parameter scalars).
    dt, L, Co, Ro = 1.0e-6, 1.0e-4, 1.0e-4, 10.0

    # --- small module-shaped case (B=8): fast path + forced single-step kernel.
    B = 8
    inputs = jax.random.uniform(k1, (B, 1), jnp.float32, 0.0, 12.0)
    states = jax.random.uniform(k2, (B, 2), jnp.float32, -1.0, 5.0)
    inputs = inputs.at[0:3, 0].set(0.0)       # exercise the diode branch
    states = states.at[0:2, 0].set(-0.25)
    ref = euler_cell_buck_ref(inputs, states, dt, L, Co, Ro)

    out_fast = euler_cell_buck(inputs, states, dt, L, Co, Ro)              # XLA path
    out_pallas = euler_cell_buck(inputs, states, dt, L, Co, Ro,
                                 min_pallas_batch=0)                       # Pallas path
    jax.block_until_ready((out_fast, out_pallas))
    assert out_pallas.shape == (B, 2) and out_pallas.dtype == jnp.float32
    assert jnp.allclose(out_fast, ref, rtol=1e-5, atol=1e-5)
    assert jnp.allclose(out_pallas, ref, rtol=1e-5, atol=1e-5)

    # --- non-aligned multi-tile case (padding + multi-block 'parallel' grid).
    B2 = 2 * 8 * LANES + 37
    inputs2 = jax.random.uniform(k3, (B2, 1), jnp.float32, 0.0, 12.0)
    states2 = jax.random.uniform(k4, (B2, 2), jnp.float32, -1.0, 5.0)
    inputs2 = inputs2.at[0:5, 0].set(0.0)
    states2 = states2.at[0:3, 0].set(-0.5)
    out2 = euler_cell_buck(inputs2, states2, dt, L, Co, Ro,
                           tile_rows=8, min_pallas_batch=0)
    jax.block_until_ready(out2)
    ref2 = euler_cell_buck_ref(inputs2, states2, dt, L, Co, Ro)
    assert jnp.allclose(out2, ref2, rtol=1e-5, atol=1e-5)

    # --- fused T-step rollout (state resident in VMEM across the time axis).
    T = 6
    va_seq = jax.random.uniform(k5, (T, B), jnp.float32, 0.0, 12.0)
    va_seq = va_seq.at[0, 0:3].set(0.0)
    out_roll = euler_buck_rollout(va_seq, states, dt, L, Co, Ro)
    jax.block_until_ready(out_roll)
    st = states
    for t in range(T):
        st = euler_cell_buck_ref(va_seq[t][:, None], st, dt, L, Co, Ro)
    assert jnp.allclose(out_roll, st, rtol=1e-5, atol=2e-5)

    print("KERNEL_OK")
</pallas_src>

<mosaic_0001>
module attributes {stable_mosaic.version = 11 : i64} {
  func.func @_euler_step_kernel(%arg0: i32, %arg1: memref<3xf32, #tpu.memory_space<smem>>, %arg2: memref<1x128xf32, #tpu.memory_space<vmem>>, %arg3: memref<1x128xf32, #tpu.memory_space<vmem>>, %arg4: memref<1x128xf32, #tpu.memory_space<vmem>>, %arg5: memref<1x128xf32, #tpu.memory_space<vmem>>, %arg6: memref<1x128xf32, #tpu.memory_space<vmem>>) attributes {dimension_semantics = [#tpu.dimension_semantics<parallel>], iteration_bounds = array<i64: 1>, scalar_prefetch = 0 : i64, scratch_operands = 0 : i64, tpu.core_type = #tpu.core_type<tc>, window_params = [{transform_indices = @transform_0, window_bounds = array<i64: 3>}, {transform_indices = @transform_1, window_bounds = array<i64: 1, 128>}, {transform_indices = @transform_2, window_bounds = array<i64: 1, 128>}, {transform_indices = @transform_3, window_bounds = array<i64: 1, 128>}, {transform_indices = @transform_4, window_bounds = array<i64: 1, 128>}, {transform_indices = @transform_5, window_bounds = array<i64: 1, 128>}]} {
    %c0 = arith.constant 0 : index
    %0 = memref.load %arg1[%c0] : memref<3xf32, #tpu.memory_space<smem>>
    %c1 = arith.constant 1 : index
    %1 = memref.load %arg1[%c1] : memref<3xf32, #tpu.memory_space<smem>>
    %c2 = arith.constant 2 : index
    %2 = memref.load %arg1[%c2] : memref<3xf32, #tpu.memory_space<smem>>
    %c0_0 = arith.constant 0 : index
    %c0_1 = arith.constant 0 : index
    %3 = vector.load %arg3[%c0_0, %c0_1] : memref<1x128xf32, #tpu.memory_space<vmem>>, vector<1x128xf32>
    %c0_2 = arith.constant 0 : index
    %c0_3 = arith.constant 0 : index
    %4 = vector.load %arg4[%c0_2, %c0_3] : memref<1x128xf32, #tpu.memory_space<vmem>>, vector<1x128xf32>
    %c0_4 = arith.constant 0 : index
    %c0_5 = arith.constant 0 : index
    %5 = vector.load %arg2[%c0_4, %c0_5] : memref<1x128xf32, #tpu.memory_space<vmem>>, vector<1x128xf32>
    %cst = arith.constant 0.000000e+00 : f32
    %6 = vector.broadcast %cst : f32 to vector<1x128xf32>
    %7 = arith.cmpf oeq, %5, %6 : vector<1x128xf32>
    %cst_6 = arith.constant 0.000000e+00 : f32
    %8 = vector.broadcast %cst_6 : f32 to vector<1x128xf32>
    %9 = arith.cmpf ole, %3, %8 : vector<1x128xf32>
    %10 = arith.andi %7, %9 : vector<1x128xi1>
    %11 = arith.select %10, %4, %5 : vector<1x128xi1>, vector<1x128xf32>
    %12 = arith.subf %11, %4 : vector<1x128xf32>
    %13 = vector.broadcast %0 : f32 to vector<1x128xf32>
    %14 = arith.mulf %13, %12 : vector<1x128xf32>
    %15 = arith.addf %3, %14 : vector<1x128xf32>
    %cst_7 = arith.constant 0.000000e+00 : f32
    %16 = vector.broadcast %cst_7 : f32 to vector<1x128xf32>
    %17 = arith.maximumf %15, %16 : vector<1x128xf32>
    %c0_8 = arith.constant 0 : index
    %c0_9 = arith.constant 0 : index
    %18 = vector.load %arg5[%c0_8, %c0_9] : memref<1x128xf32, #tpu.memory_space<vmem>>, vector<1x128xf32>
    tpu.vector_store %arg5[%c0_8, %c0_9], %17 {strides = array<i32>} : memref<1x128xf32, #tpu.memory_space<vmem>>, vector<1x128xf32>,
    %19 = vector.broadcast %2 : f32 to vector<1x128xf32>
    %20 = arith.mulf %19, %4 : vector<1x128xf32>
    %21 = vector.broadcast %1 : f32 to vector<1x128xf32>
    %22 = arith.mulf %21, %3 : vector<1x128xf32>
    %23 = arith.addf %20, %22 : vector<1x128xf32>
    %c0_10 = arith.constant 0 : index
    %c0_11 = arith.constant 0 : index
    %24 = vector.load %arg6[%c0_10, %c0_11] : memref<1x128xf32, #tpu.memory_space<vmem>>, vector<1x128xf32>
    tpu.vector_store %arg6[%c0_10, %c0_11], %23 {strides = array<i32>} : memref<1x128xf32, #tpu.memory_space<vmem>>, vector<1x128xf32>,
    return
  }
  func.func @transform_0(%arg0: i32) -> i32 {
    %c0_i32 = arith.constant 0 : i32
    %c0_i32_0 = arith.constant 0 : i32
    return %c0_i32 : i32
  }
  func.func @transform_1(%arg0: i32) -> (i32, i32) {
    %c0_i32 = arith.constant 0 : i32
    %c0_i32_0 = arith.constant 0 : i32
    return %arg0, %c0_i32 : i32, i32
  }
  func.func @transform_2(%arg0: i32) -> (i32, i32) {
    %c0_i32 = arith.constant 0 : i32
    %c0_i32_0 = arith.constant 0 : i32
    return %arg0, %c0_i32 : i32, i32
  }
  func.func @transform_3(%arg0: i32) -> (i32, i32) {
    %c0_i32 = arith.constant 0 : i32
    %c0_i32_0 = arith.constant 0 : i32
    return %arg0, %c0_i32 : i32, i32
  }
  func.func @transform_4(%arg0: i32) -> (i32, i32) {
    %c0_i32 = arith.constant 0 : i32
    %c0_i32_0 = arith.constant 0 : i32
    return %arg0, %c0_i32 : i32, i32
  }
  func.func @transform_5(%arg0: i32) -> (i32, i32) {
    %c0_i32 = arith.constant 0 : i32
    %c0_i32_0 = arith.constant 0 : i32
    return %arg0, %c0_i32 : i32, i32
  }
}

</mosaic_0001>

<bundles_post_ra>
// kernel: tpu_custom_call.1
= control target key start
LH: loop header
LB: loop body
LE: loop exit
PB: predicated region body
PF: predicated region fallthrough
CT: control target
= control target key end

     0   :  { %11 = vsyncpa [#allocation4], 0  ;;  %s193_s0 = inlined_call_operand.hbm [shape: f32[3], index: 0, kind: input, shape index: {}]   ;;  %s194_s1 = inlined_call_operand.vmem [shape: f32[1,128], index: 1, kind: input, shape index: {}]   ;;  %s195_s2 = inlined_call_operand.vmem [shape: f32[1,128], index: 2, kind: input, shape index: {}]   ;;  %s196_s3 = inlined_call_operand.vmem [shape: f32[1,128], index: 3, kind: input, shape index: {}]   ;;  %s197_s4 = inlined_call_operand.hbm [shape: f32[1,128], index: 4, kind: output, shape index: {0}]   ;;  %s198_s5 = inlined_call_operand.hbm [shape: f32[1,128], index: 5, kind: output, shape index: {1}]  }
   0x1   :  { %12 = vsyncpa [#allocation3], 0 }
   0x2   :  { %13 = vsyncpa [#allocation7], 0  ;;  %s142_s18 = smov [#allocation2]  }
   0x3   :  { %21 = dma.hbm_to_smem %s193_s0, 16, %s142_s18, [#allocation4]  }
   0x4   :  { %136 = dma.done.wait [#allocation4], 16  }
   0x5   :  { %137 = vsyncadd [#allocation4], 4294967280 }
   0x6   :  { %31 = sfence }
   0x7   :  { %s32_s21 = sld [smem:[#allocation2]]  ;;  %v35_v0 = vld [vmem:[%s195_s2] sm:$0x1]  ;;  %s143_s2 = smov [#allocation5]  }
   0x8   :  { %v36_v1 = vld [vmem:[%s196_s3] sm:$0x1]  ;;  %vm39_vm0 = vcmp.le.f32.partialorder %v35_v0, 0.0  ;;  %s83_s28 = sld [smem:[#allocation2 + $0x1]]  ;;  %s60_s29 = sshll.u32 %s143_s2, 4  ;;  %s61_s29 = int_to_ptr.vmem [resolvable:$true] %s60_s29 }
   0x9   :  { %v37_v2 = vld [vmem:[%s194_s1] sm:$0x1]  ;;  %s84_s0 = sld [smem:[#allocation2 + $0x2]]  ;;  %s144_s3 = smov [#allocation6]  }
   0xa   :  { %vm38_vm1 = vcmp.eq.f32.partialorder %v37_v2, 0.0  ;;  %s70_s30 = sshll.u32 %s144_s3, 4  ;;  %s96_s1 = scalar_lea.vmem %s61_s29, 16  ;;  %s71_s30 = int_to_ptr.vmem [resolvable:$true] %s70_s30 }
   0xb   :  { %vm40_vm2 = vmand %vm38_vm1, %vm39_vm0  ;;  %p97_p0 = scmp.ne.s32.totalorder %s61_s29, %s96_s1  ;;  %s100_s6 = scalar_lea.vmem %s61_s29, 32 }
   0xc   :  { %v41_v3 = vsel %vm40_vm2, %v36_v1, %v37_v2  ;;  %p101_p1 = scmp.lt.s32.totalorder %s61_s29, %s61_s29  ;;  %p102_p2 = scmp.lt.s32.totalorder %s100_s6, %s96_s1 }
   0xd   :  { %v42_v4 = vsub.f32 %v41_v3, %v36_v1  ;;  %v43_v5 = vstv %s32_s21 }
   0xe   :  { %v50_v7 = vstv %s83_s28  ;;  %p103_p3 = por %p102_p2, %p101_p1 }
   0xf   :  { %v44_v6 = vmul.f32 %v43_v5, %v42_v4  ;;  %v48_v8 = vstv %s84_s0  ;;  %v51_v9 = vmul.f32 %v50_v7, %v35_v0 }
  0x10   :  { %v49_v11 = vmul.f32 %v48_v8, %v36_v1  ;;  %p104_p4 = pnand %p103_p3, %p97_p0 }
  0x11   :  { %v45_v10 = vadd.f32 %v44_v6, %v35_v0 }
  0x12   :  { %v52_v13 = vadd.f32 %v51_v9, %v49_v11 }
  0x13   :  { %v46_v12 = vmax.f32 %v45_v10, 0.0 }
  0x14   :  { %53 = vst [vmem:[#allocation6] sm:$0x1] %v52_v13 }
  0x15   :  { %47 = vst [vmem:[#allocation5] sm:$0x1] %v46_v12 }
  0x16   :  { %107 = shalt.err (!%p104_p4)
}
  0x17   :  { %63 = dma.vmem_to_hbm [thread:$0]  %s61_s29, 16, %s197_s4, [#allocation3]  }
  0x18   :  { %s116_s9 = scalar_lea.vmem %s71_s30, 16  ;;  %s120_s10 = scalar_lea.vmem %s71_s30, 32 }
  0x19   :  { %p117_p5 = scmp.ne.s32.totalorder %s71_s30, %s116_s9  ;;  %p121_p6 = scmp.lt.s32.totalorder %s71_s30, %s71_s30 }
  0x1a   :  { %p122_p7 = scmp.lt.s32.totalorder %s120_s10, %s116_s9 }
  0x1c   :  { %p123_p8 = por %p122_p7, %p121_p6 }
  0x1e   :  { %p124_p9 = pnand %p123_p8, %p117_p5 }
  0x20   :  { %127 = shalt.err (!%p124_p9)
}
  0x21   :  { %73 = dma.vmem_to_hbm [thread:$0]  %s71_s30, 16, %s198_s5, [#allocation7]  }
  0x22   :  { %138 = dma.done.wait [#allocation3], 16  }
  0x23   :  { %139 = vsyncadd [#allocation3], 4294967280 }
  0x24   :  { %140 = dma.done.wait [#allocation7], 16  }
  0x25   :  { %141 = vsyncadd [#allocation7], 4294967280 }
  0x26   :  { %80 = vsyncpa [#allocation3], 1 }
  0x27   :  { %81 = vsyncpa [#allocation7], 1 }
  0x28   :  { %82 = vsyncpa [#allocation4], 1 }

</bundles_post_ra>
